<compile_context>
chip_gen: v6e
topology: v6e:2x2x1
jax: 0.10.0
libtpu: 0.0.40
codegen_flags: <defaults>
</compile_context>

<pallas_src>
import numpy as np
import jax
import jax.numpy as jnp
from jax.experimental import pallas as pl
from jax.experimental.pallas import tpu as pltpu

LANE = 128


def _round_up(x, m):
    return ((x + m - 1) // m) * m


def build_layer_dims(n_features, sequence_length, hidden_size):
    """Reproduces the numpy layer-size construction from AEModule.__init__."""
    input_length = n_features * sequence_length
    dec_steps = 2 ** np.arange(
        max(np.ceil(np.log2(hidden_size)), 2), np.log2(input_length)
    )[1:]
    dec_setup = np.concatenate([[hidden_size], dec_steps.repeat(2), [input_length]])
    enc_setup = dec_setup[::-1]
    enc_pairs = [(int(a), int(b)) for a, b in enc_setup.reshape(-1, 2)]
    dec_pairs = [(int(a), int(b)) for a, b in dec_setup.reshape(-1, 2)]
    return enc_pairs, dec_pairs


def init_params(key, layer_pairs):
    """Deterministic PyTorch-Linear-style init: U(-1/sqrt(in), 1/sqrt(in))."""
    weights, biases = [], []
    for (fan_in, fan_out) in layer_pairs:
        key, kw, kb = jax.random.split(key, 3)
        bound = 1.0 / np.sqrt(fan_in)
        # stored transposed: (in, out) so each layer is h @ W + b
        w = jax.random.uniform(kw, (fan_in, fan_out), jnp.float32, -bound, bound)
        b = jax.random.uniform(kb, (1, fan_out), jnp.float32, -bound, bound)
        weights.append(w)
        biases.append(b)
    return weights, biases


def fold_linear_chain(weights, biases, tanh_after):
    """Fold adjacent Linear layers that have no activation between them.

    h @ W1 + b1 followed by @ W2 + b2  ==  h @ (W1 @ W2) + (b1 @ W2 + b2).
    Done in f32 at pack time (exact up to re-association).  Only valid because
    the kernel never emits the latent code separately.
    """
    ws = [np.asarray(w, np.float32) for w in weights]
    bs = [np.asarray(b, np.float32).reshape(1, -1) for b in biases]
    out_w, out_b, out_t = [], [], []
    i, n = 0, len(ws)
    while i < n:
        w, b, t = ws[i], bs[i], bool(tanh_after[i])
        while (not t) and (i + 1 < n):
            w = w @ ws[i + 1]
            b = b @ ws[i + 1] + bs[i + 1]
            t = bool(tanh_after[i + 1])
            i += 1
        out_w.append(w)
        out_b.append(b)
        out_t.append(t)
        i += 1
    return out_w, out_b, out_t


def pack_params(weights, biases):
    """Per-layer padding to (round_up(in,128), round_up(out,128)); all layers
    stacked row-wise into one flat bf16 buffer.  Biases stay f32."""
    n = len(weights)
    in_pads = [_round_up(int(w.shape[0]), LANE) for w in weights]
    out_pads = [_round_up(int(w.shape[1]), LANE) for w in weights]
    max_out_pad = max(out_pads)
    row_offs = np.concatenate([[0], np.cumsum(in_pads)]).astype(int)
    total_rows = int(row_offs[-1])

    w_packed = np.zeros((total_rows, max_out_pad), np.float32)
    b_packed = np.zeros((n, 1, max_out_pad), np.float32)
    meta = []
    for i, (w, b) in enumerate(zip(weights, biases)):
        k, m = int(w.shape[0]), int(w.shape[1])
        r = int(row_offs[i])
        w_packed[r:r + k, :m] = np.asarray(w, np.float32)
        b_packed[i, 0, :m] = np.asarray(b, np.float32).reshape(-1)
        meta.append(dict(row_off=r, in_pad=in_pads[i], out_pad=out_pads[i]))

    return (jnp.asarray(w_packed, jnp.bfloat16),   # bf16 MXU operand
            jnp.asarray(b_packed, jnp.float32),    # f32 bias (VPU add stays f32)
            meta, total_rows, max_out_pad)


def make_ae_kernel(meta, tanh_after, in_dim, out_dim):
    """Kernel: x(TB, in_dim) f32, packed W (total_rows, max_out_pad) bf16,
    packed b (n_layers, 1, max_out_pad) f32, out(TB, out_dim) f32."""
    def kernel(x_ref, w_ref, b_ref, out_ref):
        h = x_ref[...]                                     # (TB, in_dim) f32
        for i, m in enumerate(meta):                       # fully unrolled, static
            r0 = m["row_off"]
            # Layer 0 consumes only the real in_dim rows (x is unpadded in the
            # feature dim).  Later layers consume the full padded lane width of
            # h: padded lanes of h are exactly 0 and the matching padded weight
            # rows are 0, so the chain equals the unpadded MLP.
            k = in_dim if i == 0 else m["in_pad"]
            n = m["out_pad"]
            w_i = w_ref[r0:r0 + k, 0:n]                    # bf16, static VMEM window
            acc = jnp.dot(h.astype(jnp.bfloat16), w_i,     # bf16 MXU, f32 accumulate
                          preferred_element_type=jnp.float32)
            h = acc + b_ref[i][:, 0:n]                     # f32 bias add (VPU)
            if tanh_after[i]:
                h = jnp.tanh(h)                            # f32 tanh (EUP)
        out_ref[...] = h[:, 0:out_dim]                     # unpadded store
    return kernel


def ae_forward_pallas(x, weights, biases, tanh_after):
    """Encoder + decoder MLP chain fused into one gridded Pallas kernel."""
    B = x.shape[0]
    x_flat = x.reshape(B, -1).astype(jnp.float32)
    in_dim = x_flat.shape[1]
    out_dim = int(weights[-1].shape[1])

    # Fold activation-free adjacent Linear pairs (encoder-last + decoder-first).
    fw, fb, ft = fold_linear_chain(weights, biases, tanh_after)
    w_packed, b_packed, meta, total_rows, max_out_pad = pack_params(fw, fb)
    n_layers = len(fw)

    # Batch tiling: >= 2 grid steps whenever B > 8 (keeps both v7x TensorCores
    # busy via "parallel"); TB up to 512 so big batches stream a long M through
    # the MXU per layer (v6e/v7x) while the grid stays small on v5e.
    if B <= 8:
        TB = 8
    else:
        TB = min(512, _round_up((B + 1) // 2, 8))
    B_pad = _round_up(B, TB)
    x_in = jnp.pad(x_flat, ((0, B_pad - B), (0, 0)))       # pad batch axis only

    kernel = make_ae_kernel(meta, ft, in_dim, out_dim)

    # Advisory cost estimate of the padded work actually executed.
    flops = 2 * B_pad * sum((in_dim if i == 0 else m["in_pad"]) * m["out_pad"]
                            for i, m in enumerate(meta))
    transcendentals = B_pad * sum(m["out_pad"] for m, t in zip(meta, ft) if t)
    bytes_accessed = (B_pad * (in_dim + out_dim) * 4
                      + int(w_packed.size) * 2 + int(b_packed.size) * 4)

    grid = (B_pad // TB,)
    out = pl.pallas_call(
        kernel,
        out_shape=jax.ShapeDtypeStruct((B_pad, out_dim), jnp.float32),
        grid=grid,
        in_specs=[
            pl.BlockSpec((TB, in_dim), lambda i: (i, 0)),                   # x tile
            pl.BlockSpec((total_rows, max_out_pad), lambda i: (0, 0)),      # packed W (resident)
            pl.BlockSpec((n_layers, 1, max_out_pad), lambda i: (0, 0, 0)),  # packed b (resident)
        ],
        out_specs=pl.BlockSpec((TB, out_dim), lambda i: (i, 0)),
        compiler_params=pltpu.CompilerParams(
            dimension_semantics=("parallel",)),
        cost_estimate=pl.CostEstimate(
            flops=int(flops),
            transcendentals=int(transcendentals),
            bytes_accessed=int(bytes_accessed)),
    )(x_in, w_packed, b_packed)

    # recon_x = dec.view(x.shape)
    # TODO(synk): return_latent=True (returning `enc` too) is not emitted; the
    # enc-last/dec-first fold assumes the recon-only output path.
    return out[:B].reshape(x.shape)


def ae_forward_reference(x, weights, biases, tanh_after):
    """Pure-JAX f32 reference (mirrors the PyTorch forward) for validation."""
    h = x.reshape(x.shape[0], -1).astype(jnp.float32)
    for i, (w, b) in enumerate(zip(weights, biases)):
        h = h @ w + b
        if tanh_after[i]:
            h = jnp.tanh(h)
    return h.reshape(x.shape)


if __name__ == "__main__":
    # Small shapes consistent with the module.
    n_features = 4
    sequence_length = 16
    hidden_size = 8
    batch = 2

    enc_pairs, dec_pairs = build_layer_dims(n_features, sequence_length, hidden_size)
    # encoder: 64->32->16->8, decoder: 8->16->32->64 (for these sizes)
    layer_pairs = enc_pairs + dec_pairs
    # nn.Sequential(*layers.flatten()[:-1]) drops the trailing activation of
    # both the encoder and the decoder.
    tanh_after = (
        [True] * (len(enc_pairs) - 1) + [False]
        + [True] * (len(dec_pairs) - 1) + [False]
    )

    key = jax.random.PRNGKey(0)
    key, kx = jax.random.split(key)
    x = jax.random.normal(kx, (batch, sequence_length, n_features), jnp.float32)

    weights, biases = init_params(key, layer_pairs)

    recon = ae_forward_pallas(x, weights, biases, tanh_after)
    jax.block_until_ready(recon)

    ref = ae_forward_reference(x, weights, biases, tanh_after)
    assert recon.shape == x.shape
    # bf16 MXU inputs (f32 accumulate / bias / tanh) -> relaxed tolerance.
    np.testing.assert_allclose(np.asarray(recon), np.asarray(ref),
                               rtol=2e-2, atol=2e-2)

    print("KERNEL_OK")
</pallas_src>

<mosaic_0001>
module attributes {stable_mosaic.version = 11 : i64} {
  func.func @kernel(%arg0: i32, %arg1: memref<8x64xf32, #tpu.memory_space<vmem>>, %arg2: memref<640x128xbf16, #tpu.memory_space<vmem>>, %arg3: memref<5x1x128xf32, #tpu.memory_space<vmem>>, %arg4: memref<8x64xf32, #tpu.memory_space<vmem>>) attributes {dimension_semantics = [#tpu.dimension_semantics<parallel>], iteration_bounds = array<i64: 1>, scalar_prefetch = 0 : i64, scratch_operands = 0 : i64, tpu.core_type = #tpu.core_type<tc>, window_params = [{transform_indices = @transform_0, window_bounds = array<i64: 8, 64>}, {pipeline_mode = #tpu.pipeline_mode<synchronous>, transform_indices = @transform_1, window_bounds = array<i64: 640, 128>}, {pipeline_mode = #tpu.pipeline_mode<synchronous>, transform_indices = @transform_2, window_bounds = array<i64: 5, 1, 128>}, {transform_indices = @transform_3, window_bounds = array<i64: 8, 64>}]} {
    %c0 = arith.constant 0 : index
    %c0_0 = arith.constant 0 : index
    %0 = vector.load %arg1[%c0, %c0_0] : memref<8x64xf32, #tpu.memory_space<vmem>>, vector<8x64xf32>
    %c0_1 = arith.constant 0 : index
    %c0_2 = arith.constant 0 : index
    %1 = vector.load %arg2[%c0_1, %c0_2] : memref<640x128xbf16, #tpu.memory_space<vmem>>, vector<64x128xbf16>
    %2 = arith.truncf %0 : vector<8x64xf32> to vector<8x64xbf16>
    %cst = arith.constant dense<0.000000e+00> : vector<8x128xf32>
    %3 = tpu.matmul %2, %1, %cst {dimension_numbers = #tpu.dot_dimension_numbers<[1], [0], [0], [1], [0, 0, 1, 1], [], []>} : vector<8x64xbf16>, vector<64x128xbf16>, vector<8x128xf32> -> vector<8x128xf32>
    %c0_3 = arith.constant 0 : index
    %c0_4 = arith.constant 0 : index
    %c0_5 = arith.constant 0 : index
    %4 = vector.load %arg3[%c0_3, %c0_4, %c0_5] : memref<5x1x128xf32, #tpu.memory_space<vmem>>, vector<1x1x128xf32>
    %5 = vector.shape_cast %4 : vector<1x1x128xf32> to vector<1x128xf32>
    %6 = vector.broadcast %5 : vector<1x128xf32> to vector<8x128xf32>
    %7 = arith.addf %3, %6 : vector<8x128xf32>
    %8 = math.tanh %7 : vector<8x128xf32>
    %c128 = arith.constant 128 : index
    %c0_6 = arith.constant 0 : index
    %9 = vector.load %arg2[%c128, %c0_6] : memref<640x128xbf16, #tpu.memory_space<vmem>>, vector<128x128xbf16>
    %10 = arith.truncf %8 : vector<8x128xf32> to vector<8x128xbf16>
    %cst_7 = arith.constant dense<0.000000e+00> : vector<8x128xf32>
    %11 = tpu.matmul %10, %9, %cst_7 {dimension_numbers = #tpu.dot_dimension_numbers<[1], [0], [0], [1], [0, 0, 1, 1], [], []>} : vector<8x128xbf16>, vector<128x128xbf16>, vector<8x128xf32> -> vector<8x128xf32>
    %c1 = arith.constant 1 : index
    %c0_8 = arith.constant 0 : index
    %c0_9 = arith.constant 0 : index
    %12 = vector.load %arg3[%c1, %c0_8, %c0_9] : memref<5x1x128xf32, #tpu.memory_space<vmem>>, vector<1x1x128xf32>
    %13 = vector.shape_cast %12 : vector<1x1x128xf32> to vector<1x128xf32>
    %14 = vector.broadcast %13 : vector<1x128xf32> to vector<8x128xf32>
    %15 = arith.addf %11, %14 : vector<8x128xf32>
    %16 = math.tanh %15 : vector<8x128xf32>
    %c256 = arith.constant 256 : index
    %c0_10 = arith.constant 0 : index
    %17 = vector.load %arg2[%c256, %c0_10] : memref<640x128xbf16, #tpu.memory_space<vmem>>, vector<128x128xbf16>
    %18 = arith.truncf %16 : vector<8x128xf32> to vector<8x128xbf16>
    %cst_11 = arith.constant dense<0.000000e+00> : vector<8x128xf32>
    %19 = tpu.matmul %18, %17, %cst_11 {dimension_numbers = #tpu.dot_dimension_numbers<[1], [0], [0], [1], [0, 0, 1, 1], [], []>} : vector<8x128xbf16>, vector<128x128xbf16>, vector<8x128xf32> -> vector<8x128xf32>
    %c2 = arith.constant 2 : index
    %c0_12 = arith.constant 0 : index
    %c0_13 = arith.constant 0 : index
    %20 = vector.load %arg3[%c2, %c0_12, %c0_13] : memref<5x1x128xf32, #tpu.memory_space<vmem>>, vector<1x1x128xf32>
    %21 = vector.shape_cast %20 : vector<1x1x128xf32> to vector<1x128xf32>
    %22 = vector.broadcast %21 : vector<1x128xf32> to vector<8x128xf32>
    %23 = arith.addf %19, %22 : vector<8x128xf32>
    %24 = math.tanh %23 : vector<8x128xf32>
    %c384 = arith.constant 384 : index
    %c0_14 = arith.constant 0 : index
    %25 = vector.load %arg2[%c384, %c0_14] : memref<640x128xbf16, #tpu.memory_space<vmem>>, vector<128x128xbf16>
    %26 = arith.truncf %24 : vector<8x128xf32> to vector<8x128xbf16>
    %cst_15 = arith.constant dense<0.000000e+00> : vector<8x128xf32>
    %27 = tpu.matmul %26, %25, %cst_15 {dimension_numbers = #tpu.dot_dimension_numbers<[1], [0], [0], [1], [0, 0, 1, 1], [], []>} : vector<8x128xbf16>, vector<128x128xbf16>, vector<8x128xf32> -> vector<8x128xf32>
    %c3 = arith.constant 3 : index
    %c0_16 = arith.constant 0 : index
    %c0_17 = arith.constant 0 : index
    %28 = vector.load %arg3[%c3, %c0_16, %c0_17] : memref<5x1x128xf32, #tpu.memory_space<vmem>>, vector<1x1x128xf32>
    %29 = vector.shape_cast %28 : vector<1x1x128xf32> to vector<1x128xf32>
    %30 = vector.broadcast %29 : vector<1x128xf32> to vector<8x128xf32>
    %31 = arith.addf %27, %30 : vector<8x128xf32>
    %32 = math.tanh %31 : vector<8x128xf32>
    %c512 = arith.constant 512 : index
    %c0_18 = arith.constant 0 : index
    %33 = vector.load %arg2[%c512, %c0_18] : memref<640x128xbf16, #tpu.memory_space<vmem>>, vector<128x128xbf16>
    %34 = arith.truncf %32 : vector<8x128xf32> to vector<8x128xbf16>
    %cst_19 = arith.constant dense<0.000000e+00> : vector<8x128xf32>
    %35 = tpu.matmul %34, %33, %cst_19 {dimension_numbers = #tpu.dot_dimension_numbers<[1], [0], [0], [1], [0, 0, 1, 1], [], []>} : vector<8x128xbf16>, vector<128x128xbf16>, vector<8x128xf32> -> vector<8x128xf32>
    %c4 = arith.constant 4 : index
    %c0_20 = arith.constant 0 : index
    %c0_21 = arith.constant 0 : index
    %36 = vector.load %arg3[%c4, %c0_20, %c0_21] : memref<5x1x128xf32, #tpu.memory_space<vmem>>, vector<1x1x128xf32>
    %37 = vector.shape_cast %36 : vector<1x1x128xf32> to vector<1x128xf32>
    %38 = vector.broadcast %37 : vector<1x128xf32> to vector<8x128xf32>
    %39 = arith.addf %35, %38 : vector<8x128xf32>
    %40 = vector.extract_strided_slice %39 {offsets = [0, 0], sizes = [8, 64], strides = [1, 1]} : vector<8x128xf32> to vector<8x64xf32>
    %c0_22 = arith.constant 0 : index
    %c0_23 = arith.constant 0 : index
    %41 = vector.load %arg4[%c0_22, %c0_23] : memref<8x64xf32, #tpu.memory_space<vmem>>, vector<8x64xf32>
    tpu.vector_store %arg4[%c0_22, %c0_23], %40 {strides = array<i32>} : memref<8x64xf32, #tpu.memory_space<vmem>>, vector<8x64xf32>,
    return
  }
  func.func @transform_0(%arg0: i32) -> (i32, i32) {
    %c0_i32 = arith.constant 0 : i32
    %c0_i32_0 = arith.constant 0 : i32
    return %arg0, %c0_i32 : i32, i32
  }
  func.func @transform_1(%arg0: i32) -> (i32, i32) {
    %c0_i32 = arith.constant 0 : i32
    %c0_i32_0 = arith.constant 0 : i32
    %c0_i32_1 = arith.constant 0 : i32
    return %c0_i32, %c0_i32_0 : i32, i32
  }
  func.func @transform_2(%arg0: i32) -> (i32, i32, i32) {
    %c0_i32 = arith.constant 0 : i32
    %c0_i32_0 = arith.constant 0 : i32
    %c0_i32_1 = arith.constant 0 : i32
    %c0_i32_2 = arith.constant 0 : i32
    return %c0_i32, %c0_i32_0, %c0_i32_1 : i32, i32, i32
  }
  func.func @transform_3(%arg0: i32) -> (i32, i32) {
    %c0_i32 = arith.constant 0 : i32
    %c0_i32_0 = arith.constant 0 : i32
    return %arg0, %c0_i32 : i32, i32
  }
}

</mosaic_0001>

<bundles_post_ra>
// kernel: tpu_custom_call.1
= control target key start
LH: loop header
LB: loop body
LE: loop exit
PB: predicated region body
PF: predicated region fallthrough
CT: control target
= control target key end

     0   :  { %8 = vsyncpa [#allocation3], 0  ;;  %s1018_s0 = inlined_call_operand.hbm [shape: f32[8,64], index: 0, kind: input, shape index: {}]   ;;  %s1019_s1 = inlined_call_operand.hbm [shape: bf16[640,128], index: 1, kind: input, shape index: {}]   ;;  %s1020_s2 = inlined_call_operand.hbm [shape: f32[5,1,128], index: 2, kind: input, shape index: {}]   ;;  %s1021_s3 = inlined_call_operand.hbm [shape: f32[8,64], index: 3, kind: output, shape index: {}]  }
   0x1   :  { %9 = vsyncpa [#allocation6], 0 }
   0x2   :  { %10 = vsyncpa [#allocation4], 0  ;;  %s928_s12 = smov [#allocation5]  }
   0x3   :  { %s26_s13 = sshll.u32 %s928_s12, 4  ;;  %s27_s13 = int_to_ptr.vmem [resolvable:$true] %s26_s13 }
   0x4   :  { %s850_s14 = scalar_lea.vmem %s27_s13, 5120  ;;  %p855_p1 = scmp.lt.s32.totalorder %s27_s13, %s27_s13 }
   0x5   :  { %p851_p0 = scmp.ne.s32.totalorder %s27_s13, %s850_s14  ;;  %p856_p2 = scmp.lt.s32.totalorder %s850_s14, %s850_s14 }
   0x7   :  { %p857_p3 = por %p856_p2, %p855_p1 }
   0x9   :  { %p858_p4 = pnand %p857_p3, %p851_p0 }
   0xb   :  { %861 = shalt.err (!%p858_p4)
}
   0xc   :  { %s929_s15 = smov 64   ;;  %s930_s16 = smov 4  }
   0xd   :  { %32 = dma.hbm_to_vmem [thread:$0]  %s1019_s1, 5120, %s27_s13, [#allocation6], %s929_s15, %s929_s15, %s930_s16  }
   0xe   :  { %s931_s19 = smov [#allocation2]   ;;  %s932_s21 = smov [#allocation7]  }
   0xf   :  { %s17_s20 = sshll.u32 %s931_s19, 4  ;;  %s38_s22 = sshll.u32 %s932_s21, 4  ;;  %s18_s20 = int_to_ptr.vmem [resolvable:$true] %s17_s20  ;;  %s39_s22 = int_to_ptr.vmem [resolvable:$true] %s38_s22 }
  0x10   :  { %s870_s23 = scalar_lea.vmem %s18_s20, 128  ;;  %p875_p6 = scmp.lt.s32.totalorder %s18_s20, %s18_s20 }
  0x11   :  { %p871_p5 = scmp.ne.s32.totalorder %s18_s20, %s870_s23  ;;  %p876_p7 = scmp.lt.s32.totalorder %s870_s23, %s870_s23 }
  0x13   :  { %p877_p8 = por %p876_p7, %p875_p6 }
  0x15   :  { %p878_p9 = pnand %p877_p8, %p871_p5 }
  0x17   :  { %881 = shalt.err (!%p878_p9)
}
  0x18   :  { %20 = dma.hbm_to_vmem [thread:$0]  %s1018_s0, 128, %s18_s20, [#allocation3]  }
  0x19   :  { %s890_s26 = scalar_lea.vmem %s39_s22, 80  ;;  %s894_s1 = scalar_lea.vmem %s39_s22, 96 }
  0x1a   :  { %p891_p10 = scmp.ne.s32.totalorder %s39_s22, %s890_s26  ;;  %p895_p11 = scmp.lt.s32.totalorder %s39_s22, %s39_s22 }
  0x1b   :  { %p896_p12 = scmp.lt.s32.totalorder %s894_s1, %s890_s26 }
  0x1d   :  { %p897_p13 = por %p896_p12, %p895_p11 }
  0x1f   :  { %p898_p0 = pnand %p897_p13, %p891_p10 }
  0x21   :  { %901 = shalt.err (!%p898_p0)
}
  0x22   :  { %s933_s27 = smov 16   ;;  %s934_s28 = smov 1  }
  0x23   :  { %44 = dma.hbm_to_vmem [thread:$0]  %s1020_s2, 80, %s39_s22, [#allocation6], %s933_s27, %s933_s27, %s934_s28  }
  0x24   :  { %922 = dma.done.wait [#allocation3], 128  }
  0x25   :  { %923 = vsyncadd [#allocation3], 4294967168 }
  0x26   :  { %924 = dma.done.wait [#allocation6], 5200  }
  0x27   :  { %925 = vsyncadd [#allocation6], 4294962096  ;;  %v935_v0 = vmov 0.0   ;;  %vm936_vm0 = vmmov 0   ;;  %v798_v1 = vld [vmem:[#allocation5 + $0x18] sm:$0xff]   ;;  %v799_v2 = vld [vmem:[#allocation5 + $0x10] sm:$0xff]  }
  0x28   :  { %696 = vmatprep.subr.bf16.mxu0 %v935_v0  ;;  %704 = vmatprep.mubr.msk.bf16.mxu0 %vm936_vm0, %v935_v0  ;;  %v802_v3 = vld [vmem:[#allocation5 + $0x78] sm:$0xff]   ;;  %v800_v4 = vld [vmem:[#allocation5 + $0x8] sm:$0xff]   ;;  %vm96_vm1 = vcmask 523264   ;;  %v803_v5 = vld [vmem:[#allocation5 + $0x70] sm:$0xff]   ;;  %s937_s0 = smov [#allocation8]  }
  0x29   :  { %708 = vmatprep.subr.bf16.mxu1 %v935_v0  ;;  %724 = vmatprep.mubr.msk.bf16.mxu1 %vm936_vm0, %v935_v0  ;;  %v801_v6 = vld [vmem:[#allocation5] sm:$0xff]   ;;  %v55_v7 = vld [vmem:[#allocation2] sm:$0xff]  ;;  %v804_v8 = vld [vmem:[#allocation5 + $0x68] sm:$0xff]   ;;  %s603_s2 = sshll.u32 %s937_s0, 4  ;;  %s604_s2 = int_to_ptr.vmem [resolvable:$true] %s603_s2 }
  0x2a   :  { %697 = vmatpush3.bf16.msra.mxu0 %v798_v1  ;;  %709 = vmatpush3.bf16.msra.mxu1 %v802_v3  ;;  %v64_v9 = vpack.c.bf16 %v55_v7, %v55_v7  ;;  %v805_v10 = vld [vmem:[#allocation5 + $0x60] sm:$0xff]   ;;  %v806_v11 = vld [vmem:[#allocation5 + $0x58] sm:$0xff]   ;;  %v807_v12 = vld [vmem:[#allocation5 + $0x50] sm:$0xff]   ;;  %s902_s4 = scalar_lea.vmem %s604_s2, 128  ;;  %p907_p2 = scmp.lt.s32.totalorder %s604_s2, %s604_s2 }
  0x2b   :  { %698 = vmatprep.subr.bf16.mxu0 %v935_v0  ;;  %710 = vmatprep.subr.bf16.mxu1 %v935_v0  ;;  %v808_v13 = vld [vmem:[#allocation5 + $0x48] sm:$0xff]   ;;  %v809_v14 = vld [vmem:[#allocation5 + $0x40] sm:$0xff]   ;;  %v810_v15 = vld [vmem:[#allocation5 + $0xb8] sm:$0xff]   ;;  %p903_p1 = scmp.ne.s32.totalorder %s604_s2, %s902_s4  ;;  %p908_p3 = scmp.lt.s32.totalorder %s902_s4, %s902_s4 }
  0x2c   :  { %v811_v16 = vld [vmem:[#allocation5 + $0xb0] sm:$0xff]   ;;  %v812_v17 = vld [vmem:[#allocation5 + $0xa8] sm:$0xff]   ;;  %v613_v18 = vld [vmem:[#allocation7] ss:$0 sm:$0xff] }
  0x2d   :  { %v813_v26 = vld [vmem:[#allocation5 + $0xa0] sm:$0xff]   ;;  %v814_v27 = vld [vmem:[#allocation5 + $0x98] sm:$0xff]   ;;  %v815_v28 = vld [vmem:[#allocation5 + $0x90] sm:$0xff]   ;;  %p909_p4 = por %p908_p3, %p907_p2 }
  0x2e   :  { %699 = vmatpush3.bf16.msra.mxu0 %v799_v2  ;;  %711 = vmatpush3.bf16.msra.mxu1 %v803_v5  ;;  %v816_v29 = vld [vmem:[#allocation5 + $0x88] sm:$0xff]   ;;  %v817_v30 = vld [vmem:[#allocation5 + $0x80] sm:$0xff]   ;;  %v818_v31 = vld [vmem:[#allocation5 + $0xf8] sm:$0xff]  }
  0x2f   :  { %700 = vmatprep.subr.bf16.mxu0 %v935_v0  ;;  %712 = vmatprep.subr.bf16.mxu1 %v935_v0  ;;  %v819_v32 = vld [vmem:[#allocation5 + $0xf0] sm:$0xff]   ;;  %v820_v33 = vld [vmem:[#allocation5 + $0xe8] sm:$0xff]   ;;  %v619_v34 = vld [vmem:[#allocation7 + $0x1] ss:$0 sm:$0xff]  ;;  %p910_p5 = pnand %p909_p4, %p903_p1 }
  0x30   :  { %v821_v42 = vld [vmem:[#allocation5 + $0xe0] sm:$0xff]   ;;  %v822_v43 = vld [vmem:[#allocation5 + $0xd8] sm:$0xff]   ;;  %v823_v44 = vld [vmem:[#allocation5 + $0xd0] sm:$0xff]  }
  0x31   :  { %v824_v45 = vld [vmem:[#allocation5 + $0xc8] sm:$0xff]   ;;  %v825_v46 = vld [vmem:[#allocation5 + $0xc0] sm:$0xff]   ;;  %v826_v47 = vld [vmem:[#allocation5 + $0x138] sm:$0xff]  }
  0x32   :  { %701 = vmatpush3.bf16.msra.mxu0 %v800_v4  ;;  %713 = vmatpush3.bf16.msra.mxu1 %v804_v8  ;;  %v827_v48 = vld [vmem:[#allocation5 + $0x130] sm:$0xff]   ;;  %v828_v49 = vld [vmem:[#allocation5 + $0x128] sm:$0xff]   ;;  %v628_v50 = vld [vmem:[#allocation7 + $0x2] ss:$0 sm:$0xff] }
  0x33   :  { %702 = vmatprep.subr.bf16.mxu0 %v935_v0  ;;  %714 = vmatprep.subr.bf16.mxu1 %v935_v0  ;;  %v829_v58 = vld [vmem:[#allocation5 + $0x120] sm:$0xff]   ;;  %v830_v59 = vld [vmem:[#allocation5 + $0x118] sm:$0xff]   ;;  %v831_v60 = vld [vmem:[#allocation5 + $0x110] sm:$0xff]  }
  0x34   :  { %v832_v61 = vld [vmem:[#allocation5 + $0x108] sm:$0xff]   ;;  %v833_v62 = vld [vmem:[#allocation5 + $0x100] sm:$0xff]  }
  0x35   :  { %v637_v63 = vld [vmem:[#allocation7 + $0x3] ss:$0 sm:$0xff]  ;;  %v646_v8 = vld [vmem:[#allocation7 + $0x4] ss:$0 sm:$0xff] }
  0x36   :  { %703 = vmatpush3.bf16.msra.mxu0 %v801_v6  ;;  %715 = vmatpush3.bf16.msra.mxu1 %v805_v10 }
  0x37   :  { %728 = vmatprep.subr.bf16.mxu0 %v935_v0  ;;  %716 = vmatprep.subr.bf16.mxu1 %v935_v0 }
  0x39   :  { %705 = vmatmul.mubr.msk.bf16.vlgmr.msra.gmra.mxu0 %vm96_vm1, %v64_v9 }
  0x3a   :  { %744 = vmatprep.mubr.msk.bf16.mxu0 %vm936_vm0, %v935_v0  ;;  %717 = vmatpush3.bf16.msra.mxu1 %v806_v11 }
  0x3b   :  { %718 = vmatprep.subr.bf16.mxu1 %v935_v0  ;;  %729 = vmatpush3.bf16.msra.mxu0 %v810_v15 }
  0x3c   :  { %730 = vmatprep.subr.bf16.mxu0 %v935_v0 }
  0x3e   :  { %719 = vmatpush3.bf16.msra.mxu1 %v807_v12 }
  0x3f   :  { %720 = vmatprep.subr.bf16.mxu1 %v935_v0  ;;  %731 = vmatpush3.bf16.msra.mxu0 %v811_v16 }
  0x40   :  { %732 = vmatprep.subr.bf16.mxu0 %v935_v0 }
  0x42   :  { %721 = vmatpush3.bf16.msra.mxu1 %v808_v13 }
  0x43   :  { %722 = vmatprep.subr.bf16.mxu1 %v935_v0  ;;  %733 = vmatpush3.bf16.msra.mxu0 %v812_v17 }
  0x44   :  { %734 = vmatprep.subr.bf16.mxu0 %v935_v0 }
  0x46   :  { %723 = vmatpush3.bf16.msra.mxu1 %v809_v14 }
  0x47   :  { %748 = vmatprep.subr.bf16.mxu1 %v935_v0  ;;  %735 = vmatpush3.bf16.msra.mxu0 %v813_v26 }
  0x48   :  { %736 = vmatprep.subr.bf16.mxu0 %v935_v0 }
  0x4b   :  { %737 = vmatpush3.bf16.msra.mxu0 %v814_v27 }
  0x4c   :  { %738 = vmatprep.subr.bf16.mxu0 %v935_v0 }
  0x4f   :  { %739 = vmatpush3.bf16.msra.mxu0 %v815_v28 }
  0x50   :  { %740 = vmatprep.subr.bf16.mxu0 %v935_v0 }
  0x53   :  { %741 = vmatpush3.bf16.msra.mxu0 %v816_v29 }
  0x54   :  { %742 = vmatprep.subr.bf16.mxu0 %v935_v0 }
  0x57   :  { %743 = vmatpush3.bf16.msra.mxu0 %v817_v30 }
  0x58   :  { %768 = vmatprep.subr.bf16.mxu0 %v935_v0 }
  0xf9   :  { %v134_v19 = vpop.f32.mrf.mxu0 }
  0xfa   :  { %v135_v20 = vadd.f32 %v613_v18, %v134_v19 }
  0xfb   :  { %v706_v21 = vpop.f32.mrf.mxu0 }
  0xfc   :  { %834 = vtanh.f32 %v135_v20 }
  0xfd   :  { %v137_v22 = vpop.f32.mrf.mxu0 }
  0xff   :  { %v707_v23 = vpop.f32.mrf.mxu0 }
 0x109   :  { %v835_v24 = vpop.eup %834 }
 0x10a   :  { %v157_v25 = vpack.c.bf16 %v835_v24, %v835_v24 }
 0x10c   :  { %725 = vmatmul.mubr.bf16.vlgmr.msra.gmra.mxu1 %v157_v25 }
 0x10d   :  { %764 = vmatprep.mubr.msk.bf16.mxu1 %vm936_vm0, %v935_v0  ;;  %749 = vmatpush3.bf16.msra.mxu1 %v818_v31 }
 0x10e   :  { %750 = vmatprep.subr.bf16.mxu1 %v935_v0 }
 0x111   :  { %751 = vmatpush3.bf16.msra.mxu1 %v819_v32 }
 0x112   :  { %752 = vmatprep.subr.bf16.mxu1 %v935_v0 }
 0x115   :  { %753 = vmatpush3.bf16.msra.mxu1 %v820_v33 }
 0x116   :  { %754 = vmatprep.subr.bf16.mxu1 %v935_v0 }
 0x119   :  { %755 = vmatpush3.bf16.msra.mxu1 %v821_v42 }
 0x11a   :  { %756 = vmatprep.subr.bf16.mxu1 %v935_v0 }
 0x11d   :  { %757 = vmatpush3.bf16.msra.mxu1 %v822_v43 }
 0x11e   :  { %758 = vmatprep.subr.bf16.mxu1 %v935_v0 }
 0x121   :  { %759 = vmatpush3.bf16.msra.mxu1 %v823_v44 }
 0x122   :  { %760 = vmatprep.subr.bf16.mxu1 %v935_v0 }
 0x125   :  { %761 = vmatpush3.bf16.msra.mxu1 %v824_v45 }
 0x126   :  { %762 = vmatprep.subr.bf16.mxu1 %v935_v0 }
 0x129   :  { %763 = vmatpush3.bf16.msra.mxu1 %v825_v46 }
 0x1cc   :  { %v248_v35 = vpop.f32.mrf.mxu1 }
 0x1cd   :  { %v249_v36 = vadd.f32 %v619_v34, %v248_v35 }
 0x1ce   :  { %v726_v37 = vpop.f32.mrf.mxu1 }
 0x1cf   :  { %836 = vtanh.f32 %v249_v36 }
 0x1d0   :  { %v251_v38 = vpop.f32.mrf.mxu1 }
 0x1d2   :  { %v727_v39 = vpop.f32.mrf.mxu1 }
 0x1dc   :  { %v837_v40 = vpop.eup %836 }
 0x1dd   :  { %v271_v41 = vpack.c.bf16 %v837_v40, %v837_v40 }
 0x1df   :  { %745 = vmatmul.mubr.bf16.vlgmr.msra.gmra.mxu0 %v271_v41 }
 0x1e0   :  { %784 = vmatprep.mubr.msk.bf16.mxu0 %vm936_vm0, %v935_v0  ;;  %769 = vmatpush3.bf16.msra.mxu0 %v826_v47 }
 0x1e1   :  { %770 = vmatprep.subr.bf16.mxu0 %v935_v0 }
 0x1e4   :  { %771 = vmatpush3.bf16.msra.mxu0 %v827_v48 }
 0x1e5   :  { %772 = vmatprep.subr.bf16.mxu0 %v935_v0 }
 0x1e8   :  { %773 = vmatpush3.bf16.msra.mxu0 %v828_v49 }
 0x1e9   :  { %774 = vmatprep.subr.bf16.mxu0 %v935_v0 }
 0x1ec   :  { %775 = vmatpush3.bf16.msra.mxu0 %v829_v58 }
 0x1ed   :  { %776 = vmatprep.subr.bf16.mxu0 %v935_v0 }
 0x1f0   :  { %777 = vmatpush3.bf16.msra.mxu0 %v830_v59 }
 0x1f1   :  { %778 = vmatprep.subr.bf16.mxu0 %v935_v0 }
 0x1f4   :  { %779 = vmatpush3.bf16.msra.mxu0 %v831_v60 }
 0x1f5   :  { %780 = vmatprep.subr.bf16.mxu0 %v935_v0 }
 0x1f8   :  { %781 = vmatpush3.bf16.msra.mxu0 %v832_v61 }
 0x1f9   :  { %782 = vmatprep.subr.bf16.mxu0 %v935_v0 }
 0x1fc   :  { %783 = vmatpush3.bf16.msra.mxu0 %v833_v62 }
 0x29f   :  { %v362_v51 = vpop.f32.mrf.mxu0 }
 0x2a0   :  { %v363_v52 = vadd.f32 %v628_v50, %v362_v51 }
 0x2a1   :  { %v746_v53 = vpop.f32.mrf.mxu0 }
 0x2a2   :  { %838 = vtanh.f32 %v363_v52 }
 0x2a3   :  { %v365_v54 = vpop.f32.mrf.mxu0 }
 0x2a5   :  { %v747_v55 = vpop.f32.mrf.mxu0 }
 0x2af   :  { %v839_v56 = vpop.eup %838 }
 0x2b0   :  { %v385_v57 = vpack.c.bf16 %v839_v56, %v839_v56 }
 0x2b2   :  { %765 = vmatmul.mubr.bf16.vlgmr.msra.gmra.mxu1 %v385_v57 }
 0x372   :  { %v476_v1 = vpop.f32.mrf.mxu1 }
 0x373   :  { %v477_v2 = vadd.f32 %v637_v63, %v476_v1 }
 0x374   :  { %v766_v3 = vpop.f32.mrf.mxu1 }
 0x375   :  { %840 = vtanh.f32 %v477_v2 }
 0x376   :  { %v479_v4 = vpop.f32.mrf.mxu1 }
 0x378   :  { %v767_v5 = vpop.f32.mrf.mxu1 }
 0x382   :  { %v841_v6 = vpop.eup %840 }
 0x383   :  { %v499_v7 = vpack.c.bf16 %v841_v6, %v841_v6 }
 0x385   :  { %785 = vmatmul.mubr.bf16.vlgmr.msra.gmra.mxu0 %v499_v7 }
 0x445   :  { %v590_v9 = vpop.f32.mrf.mxu0 }
 0x446   :  { %v591_v10 = vadd.f32 %v646_v8, %v590_v9 }
 0x447   :  { %v786_v11 = vpop.f32.mrf.mxu0 }
 0x448   :  { %596 = vst.msk [vmem:[#allocation8] sm:$0xff] %vm96_vm1, %v591_v10 }
 0x449   :  { %v593_v0 = vpop.f32.mrf.mxu0 }
 0x44a   :  { %913 = shalt.err (!%p910_p5)
}
 0x44b   :  { %606 = dma.vmem_to_hbm [thread:$0]  %s604_s2, 128, %s1021_s3, [#allocation4]   ;;  %v787_v12 = vpop.f32.mrf.mxu0 }
 0x44c   :  { %926 = dma.done.wait [#allocation4], 128  }
 0x44d   :  { %927 = vsyncadd [#allocation4], 4294967168 }
 0x44e   :  { %610 = vsyncpa [#allocation3], 1 }
 0x44f   :  { %611 = vsyncpa [#allocation6], 1 }
 0x450   :  { %612 = vsyncpa [#allocation4], 1 }

</bundles_post_ra>
